<compile_context>
chip_gen: v7x
topology: tpu7x:2x2x1
jax: 0.10.0
libtpu: 0.0.40
codegen_flags: <defaults>
</compile_context>

<pallas_src>
import functools

import numpy as np
import jax
import jax.numpy as jnp
from jax.experimental import pallas as pl
from jax.experimental.pallas import tpu as pltpu


# ----------------------------- parameter construction (deterministic) -----------------------------

def _hann_window(n_fft):
    # torch.hann_window(periodic=True)
    n = np.arange(n_fft)
    return 0.5 - 0.5 * np.cos(2.0 * np.pi * n / n_fft)


def _dft_matrices(n_fft, n_freqs):
    # one-sided real DFT (first n_freqs bins): power only needs cos/sin.
    n = np.arange(n_fft)[:, None].astype(np.float64)
    k = np.arange(n_freqs)[None, :].astype(np.float64)
    ang = 2.0 * np.pi * n * k / n_fft
    return np.cos(ang), np.sin(ang)  # each (n_fft, n_freqs)


def _mel_filterbank(n_freqs, f_min, f_max, n_mels, sample_rate):
    # torchaudio.functional.melscale_fbanks with mel_scale='htk', norm=None
    def hz_to_mel(f):
        return 2595.0 * np.log10(1.0 + f / 700.0)

    def mel_to_hz(m):
        return 700.0 * (10.0 ** (m / 2595.0) - 1.0)

    all_freqs = np.linspace(0.0, sample_rate // 2, n_freqs)
    m_min, m_max = hz_to_mel(f_min), hz_to_mel(f_max)
    m_pts = np.linspace(m_min, m_max, n_mels + 2)
    f_pts = mel_to_hz(m_pts)
    f_diff = f_pts[1:] - f_pts[:-1]                   # (n_mels + 1,)
    slopes = f_pts[None, :] - all_freqs[:, None]      # (n_freqs, n_mels + 2)
    down_slopes = -slopes[:, :-2] / f_diff[:-1]
    up_slopes = slopes[:, 2:] / f_diff[1:]
    fb = np.maximum(0.0, np.minimum(down_slopes, up_slopes))
    return fb                                         # (n_freqs, n_mels)


def _round_up(x, m):
    return ((x + m - 1) // m) * m


# ----------------------------- Pallas kernel -----------------------------

def _logmel_mse_kernel(pred_ref, tgt_ref, dft_ref, fb_ref, out_ref, *, n_freqs, tile_m):
    dft = dft_ref[...]                                 # (n_fft, 2*n_freqs)  window folded in, bf16
    fb = fb_ref[...]                                   # (n_freqs, n_mels), f32

    # one MXU weight-staging/drain sequence per tile: pred and tgt stacked along M
    frames = jnp.concatenate([pred_ref[...], tgt_ref[...]], axis=0)      # (2*tile_m, n_fft)
    ri = jnp.dot(frames, dft, preferred_element_type=jnp.float32)        # (2*tile_m, 2*n_freqs) f32
    re = ri[:, :n_freqs]
    im = ri[:, n_freqs:]
    power = re * re + im * im                          # |STFT|^2 (Nyquist bin dropped: zero mel weight)
    mel = jnp.dot(power, fb, preferred_element_type=jnp.float32)         # (2*tile_m, n_mels) f32
    logmel = jnp.log(mel + 1e-9)

    diff = logmel[:tile_m] - logmel[tile_m:]           # (tile_m, n_mels)
    # per-tile, per-mel partial sums (sublane reduce only); final sum/scale done outside
    out_ref[...] = jnp.sum(diff * diff, axis=0, keepdims=True)


# ----------------------------- wrapper -----------------------------

def log_mel_spectrogram_loss(pred_audio, tgt_audio, *,
                             sample_rate=48000, n_fft=2048, hop_length=512, n_mels=128,
                             tile_m=None, compute_dtype=jnp.bfloat16):
    B, L = pred_audio.shape
    pad = n_fft // 2
    n_frames = 1 + L // hop_length                     # torch.stft with center=True
    n_freqs_full = n_fft // 2 + 1
    n_freqs = n_fft // 2                               # drop Nyquist bin (exactly zero mel weight
                                                       # when f_min=0, f_max=sr/2) -> lane-aligned dims
    two_f = 2 * n_freqs

    # Fused window * [cos | sin] real-DFT matrix (bf16 for the MXU; f32 accumulation in-kernel).
    win = _hann_window(n_fft)[:, None]
    cos_np, sin_np = _dft_matrices(n_fft, n_freqs)
    dft_np = np.concatenate([win * cos_np, win * sin_np], axis=1)        # (n_fft, 2*n_freqs)
    fb_np = _mel_filterbank(n_freqs_full, 0.0, sample_rate / 2.0, n_mels,
                            sample_rate)[:n_freqs]                        # (n_freqs, n_mels)

    dft_m = jnp.asarray(dft_np, compute_dtype)
    fb = jnp.asarray(fb_np, jnp.float32)

    # ---- generation-aware VMEM budget / tile size ----
    try:
        vmem_cap = int(pltpu.get_tpu_info().vmem_capacity_bytes)
    except Exception:
        vmem_cap = 64 * 1024 * 1024                    # conservative (v7x-sized) fallback
    if tile_m is None:
        tile_m = 512 if vmem_cap > 80 * 1024 * 1024 else 256   # 128 MiB parts get bigger tiles

    # ---- framing (JAX glue; reflect pad + hop-strided windows) ----
    # TODO(synk): could DMA contiguous sample strips with memory_space=pl.ANY and build
    # overlapping frames in-kernel to avoid this ~4x-duplicated HBM intermediate.
    def frame(x):
        xp = jnp.pad(x.astype(jnp.float32), ((0, 0), (pad, pad)), mode="reflect")
        idx = jnp.arange(n_frames)[:, None] * hop_length + jnp.arange(n_fft)[None, :]
        return xp[:, idx].reshape(B * n_frames, n_fft)                    # (M, n_fft)

    m_total = B * n_frames
    tile_m = int(min(tile_m, _round_up(m_total, 16)))                     # 16: safe for f32 & bf16 tiles
    m_pad = _round_up(m_total, tile_m)
    num_tiles = m_pad // tile_m

    def frame_and_pad(x):
        f = frame(x)
        f = jnp.pad(f, ((0, m_pad - m_total), (0, 0)))                    # zero frames cancel in MSE
        return f.astype(compute_dtype)

    frames_pred = frame_and_pad(pred_audio)
    frames_tgt = frame_and_pad(tgt_audio)

    inv_count = 1.0 / float(B * n_mels * n_frames)                        # true (unpadded) element count
    kernel = functools.partial(_logmel_mse_kernel, n_freqs=n_freqs, tile_m=tile_m)

    # ---- VMEM estimate (single-buffered weights, double-buffered frame tiles, f32 intermediates) ----
    bpe = jnp.dtype(compute_dtype).itemsize
    rows = 2 * tile_m
    vmem_est = int(
        n_fft * two_f * bpe                # fused DFT matrix (resident, single buffer)
        + n_freqs * n_mels * 4             # mel filterbank (resident, single buffer)
        + 2 * 2 * tile_m * n_fft * bpe     # pred/tgt frame tiles, double-buffered
        + rows * n_fft * bpe               # in-kernel concatenated tile
        + rows * two_f * 4                 # [re | im] f32 matmul result
        + 3 * rows * n_freqs * 4           # re / im / power intermediates
        + 3 * rows * n_mels * 4            # mel / log / diff
        + 2 * num_tiles * n_mels * 4       # output partials
        + (4 << 20)                        # headroom
    )
    vmem_limit = int(min(max(vmem_est, 32 * 1024 * 1024), int(0.85 * vmem_cap)))

    flops = int(2 * m_pad * (2 * n_fft * two_f + 2 * n_freqs * n_mels + 3 * n_freqs + 2 * n_mels))
    cost = pl.CostEstimate(
        flops=flops,
        transcendentals=int(2 * m_pad * n_mels),
        bytes_accessed=int(2 * m_pad * n_fft * bpe + n_fft * two_f * bpe
                           + n_freqs * n_mels * 4 + num_tiles * n_mels * 4),
    )

    partials = pl.pallas_call(
        kernel,
        out_shape=jax.ShapeDtypeStruct((num_tiles, n_mels), jnp.float32),
        grid_spec=pltpu.PrefetchScalarGridSpec(
            num_scalar_prefetch=0,
            grid=(num_tiles,),
            in_specs=[
                pl.BlockSpec((tile_m, n_fft), lambda i: (i, 0)),          # pred frames (pipelined)
                pl.BlockSpec((tile_m, n_fft), lambda i: (i, 0)),          # tgt frames  (pipelined)
                pl.BlockSpec((n_fft, two_f), lambda i: (0, 0),
                             pipeline_mode=pl.Buffered(1)),               # fused window*DFT (resident)
                pl.BlockSpec((n_freqs, n_mels), lambda i: (0, 0),
                             pipeline_mode=pl.Buffered(1)),               # mel filterbank  (resident)
            ],
            out_specs=pl.BlockSpec((1, n_mels), lambda i: (i, 0)),        # per-tile partial-sum row
        ),
        compiler_params=pltpu.CompilerParams(
            dimension_semantics=("parallel",),                            # independent tiles -> megacore
            vmem_limit_bytes=vmem_limit),
        cost_estimate=cost,
    )(frames_pred, frames_tgt, dft_m, fb)

    # tiny final reduction + mean scaling in plain JAX (also keeps long-audio accumulation in f32)
    return jnp.sum(partials) * inv_count


# ----------------------------- demo -----------------------------

if __name__ == "__main__":
    # Small, module-consistent configuration (constructor args are configurable).
    sample_rate, n_fft, hop_length, n_mels = 16000, 256, 64, 32
    B, L = 2, 1024

    key = jax.random.PRNGKey(0)
    k1, k2 = jax.random.split(key)
    predicted_audio = jax.random.normal(k1, (B, L), jnp.float32)
    target_audio = jax.random.normal(k2, (B, L), jnp.float32)

    loss = log_mel_spectrogram_loss(
        predicted_audio, target_audio,
        sample_rate=sample_rate, n_fft=n_fft, hop_length=hop_length, n_mels=n_mels)
    jax.block_until_ready(loss)
    print("KERNEL_OK")
</pallas_src>

<mosaic_0001>
module attributes {stable_mosaic.version = 11 : i64} {
  func.func @_logmel_mse_kernel(%arg0: i32, %arg1: memref<48x256xbf16, #tpu.memory_space<vmem>>, %arg2: memref<48x256xbf16, #tpu.memory_space<vmem>>, %arg3: memref<256x256xbf16, #tpu.memory_space<vmem>>, %arg4: memref<128x32xf32, #tpu.memory_space<vmem>>, %arg5: memref<1x32xf32, #tpu.memory_space<vmem>>) attributes {dimension_semantics = [#tpu.dimension_semantics<parallel>], iteration_bounds = array<i64: 1>, scalar_prefetch = 0 : i64, scratch_operands = 0 : i64, tpu.core_type = #tpu.core_type<tc>, window_params = [{transform_indices = @transform_0, window_bounds = array<i64: 48, 256>}, {transform_indices = @transform_1, window_bounds = array<i64: 48, 256>}, {pipeline_mode = #tpu.pipeline_mode<synchronous>, transform_indices = @transform_2, window_bounds = array<i64: 256, 256>}, {pipeline_mode = #tpu.pipeline_mode<synchronous>, transform_indices = @transform_3, window_bounds = array<i64: 128, 32>}, {transform_indices = @transform_4, window_bounds = array<i64: 1, 32>}]} {
    %c0 = arith.constant 0 : index
    %c0_0 = arith.constant 0 : index
    %0 = vector.load %arg3[%c0, %c0_0] : memref<256x256xbf16, #tpu.memory_space<vmem>>, vector<256x256xbf16>
    %c0_1 = arith.constant 0 : index
    %c0_2 = arith.constant 0 : index
    %1 = vector.load %arg4[%c0_1, %c0_2] : memref<128x32xf32, #tpu.memory_space<vmem>>, vector<128x32xf32>
    %c0_3 = arith.constant 0 : index
    %c0_4 = arith.constant 0 : index
    %2 = vector.load %arg1[%c0_3, %c0_4] : memref<48x256xbf16, #tpu.memory_space<vmem>>, vector<48x256xbf16>
    %c0_5 = arith.constant 0 : index
    %c0_6 = arith.constant 0 : index
    %3 = vector.load %arg2[%c0_5, %c0_6] : memref<48x256xbf16, #tpu.memory_space<vmem>>, vector<48x256xbf16>
    %4 = tpu.concatenate %2, %3 in 0 : vector<48x256xbf16>, vector<48x256xbf16> -> vector<96x256xbf16>
    %cst = arith.constant dense<0.000000e+00> : vector<96x256xf32>
    %5 = tpu.matmul %4, %0, %cst {dimension_numbers = #tpu.dot_dimension_numbers<[1], [0], [0], [1], [0, 0, 1, 1], [], []>} : vector<96x256xbf16>, vector<256x256xbf16>, vector<96x256xf32> -> vector<96x256xf32>
    %6 = vector.extract_strided_slice %5 {offsets = [0, 0], sizes = [96, 128], strides = [1, 1]} : vector<96x256xf32> to vector<96x128xf32>
    %7 = vector.extract_strided_slice %5 {offsets = [0, 128], sizes = [96, 128], strides = [1, 1]} : vector<96x256xf32> to vector<96x128xf32>
    %8 = arith.mulf %6, %6 : vector<96x128xf32>
    %9 = arith.mulf %7, %7 : vector<96x128xf32>
    %10 = arith.addf %8, %9 : vector<96x128xf32>
    %cst_7 = arith.constant dense<0.000000e+00> : vector<96x32xf32>
    %11 = tpu.matmul %10, %1, %cst_7 {dimension_numbers = #tpu.dot_dimension_numbers<[1], [0], [0], [1], [0, 0, 1, 1], [], []>} : vector<96x128xf32>, vector<128x32xf32>, vector<96x32xf32> -> vector<96x32xf32>
    %cst_8 = arith.constant 9.99999971E-10 : f32
    %12 = vector.broadcast %cst_8 : f32 to vector<96x32xf32>
    %13 = arith.addf %11, %12 : vector<96x32xf32>
    %14 = math.log %13 : vector<96x32xf32>
    %15 = vector.extract_strided_slice %14 {offsets = [0, 0], sizes = [48, 32], strides = [1, 1]} : vector<96x32xf32> to vector<48x32xf32>
    %16 = vector.extract_strided_slice %14 {offsets = [48, 0], sizes = [48, 32], strides = [1, 1]} : vector<96x32xf32> to vector<48x32xf32>
    %17 = arith.subf %15, %16 : vector<48x32xf32>
    %18 = arith.mulf %17, %17 : vector<48x32xf32>
    %cst_9 = arith.constant dense<0.000000e+00> : vector<32xf32>
    %19 = vector.multi_reduction <add>, %18, %cst_9 [0] : vector<48x32xf32> to vector<32xf32>
    %20 = vector.shape_cast %19 : vector<32xf32> to vector<1x32xf32>
    %c0_10 = arith.constant 0 : index
    %c0_11 = arith.constant 0 : index
    %21 = vector.load %arg5[%c0_10, %c0_11] : memref<1x32xf32, #tpu.memory_space<vmem>>, vector<1x32xf32>
    tpu.vector_store %arg5[%c0_10, %c0_11], %20 {strides = array<i32>} : memref<1x32xf32, #tpu.memory_space<vmem>>, vector<1x32xf32>,
    return
  }
  func.func @transform_0(%arg0: i32) -> (i32, i32) {
    %c0_i32 = arith.constant 0 : i32
    %c0_i32_0 = arith.constant 0 : i32
    return %arg0, %c0_i32 : i32, i32
  }
  func.func @transform_1(%arg0: i32) -> (i32, i32) {
    %c0_i32 = arith.constant 0 : i32
    %c0_i32_0 = arith.constant 0 : i32
    return %arg0, %c0_i32 : i32, i32
  }
  func.func @transform_2(%arg0: i32) -> (i32, i32) {
    %c0_i32 = arith.constant 0 : i32
    %c0_i32_0 = arith.constant 0 : i32
    %c0_i32_1 = arith.constant 0 : i32
    return %c0_i32, %c0_i32_0 : i32, i32
  }
  func.func @transform_3(%arg0: i32) -> (i32, i32) {
    %c0_i32 = arith.constant 0 : i32
    %c0_i32_0 = arith.constant 0 : i32
    %c0_i32_1 = arith.constant 0 : i32
    return %c0_i32, %c0_i32_0 : i32, i32
  }
  func.func @transform_4(%arg0: i32) -> (i32, i32) {
    %c0_i32 = arith.constant 0 : i32
    %c0_i32_0 = arith.constant 0 : i32
    return %arg0, %c0_i32 : i32, i32
  }
}

</mosaic_0001>

<bundles_post_ra>
// kernel: tpu_custom_call.1
= control target key start
LH: loop header
LB: loop body
LE: loop exit
PB: predicated region body
PF: predicated region fallthrough
CT: control target
= control target key end

     0   :  { %9 = vsyncpa [#allocation3], 0  ;;  %s1076_s0 = inlined_call_operand.vmem [shape: bf16[48,256], index: 0, kind: input, shape index: {}]   ;;  %s1077_s1 = inlined_call_operand.vmem [shape: bf16[48,256], index: 1, kind: input, shape index: {}]   ;;  %s1078_s2 = inlined_call_operand.hbm [shape: bf16[256,256], index: 2, kind: input, shape index: {}]   ;;  %s1079_s3 = inlined_call_operand.vmem [shape: f32[128,32], index: 3, kind: input, shape index: {}]   ;;  %s1080_s4 = inlined_call_operand.hbm [shape: f32[1,32], index: 4, kind: output, shape index: {}]  }
   0x1   :  { %10 = vsyncpa [#allocation4], 0  ;;  %s933_s15 = smov [#allocation2]   ;;  %s885_s19 = scalar_lea.hbm %s1078_s2, 4096 }
   0x2   :  { %s20_s16 = sshll.u32 %s933_s15, 4  ;;  %p886_p0 = scmp.ne.s32.totalorder %s1078_s2, %s885_s19  ;;  %s21_s16 = int_to_ptr.vmem [resolvable:$true] %s20_s16 }
   0x3   :  { %p889_p1 = scmp.lt.u32.totalorder %s885_s19, %s1078_s2 }
   0x5   :  { %p891_p2 = pnand %p889_p1, %p886_p0 }
   0x7   :  { %894 = shalt.err (!%p891_p2)
}
   0x8   :  { %s895_s24 = scalar_lea.vmem %s21_s16, 4096  ;;  %p900_p4 = scmp.lt.s32.totalorder %s21_s16, %s21_s16 }
   0x9   :  { %p896_p3 = scmp.ne.s32.totalorder %s21_s16, %s895_s24  ;;  %p901_p5 = scmp.lt.s32.totalorder %s895_s24, %s895_s24 }
   0xb   :  { %p902_p6 = por %p901_p5, %p900_p4 }
   0xd   :  { %p903_p7 = pnand %p902_p6, %p896_p3 }
   0xf   :  { %906 = shalt.err (!%p903_p7)
}
  0x10   :  { %s934_s25 = smov 128   ;;  %s935_s26 = smov 8  }
  0x11   :  { %26 = dma.hbm_to_vmem [thread:$0]  %s1078_s2, 4096, %s21_s16, [#allocation3], %s934_s25, %s934_s25, %s935_s26  }
  0x12   :  { %929 = dma.done.wait [#allocation3], 4096  }
  0x13   :  { %930 = vsyncadd [#allocation3], 4294963200  ;;  %v795_v0 = vld [vmem:[#allocation2 + $0x4] ss:$8 sps:$4 sm:$0xff]   ;;  %v797_v1 = vld [vmem:[#allocation2] ss:$8 sps:$4 sm:$0xff]  }
  0x14   :  { %312 = vmatprep.subr.bf16.mxu0 %v795_v0  ;;  %v798_v2 = vld [vmem:[#allocation2 + $0x14] ss:$8 sps:$4 sm:$0xff]   ;;  %v800_v3 = vld [vmem:[#allocation2 + $0x10] ss:$8 sps:$4 sm:$0xff]   ;;  %v801_v4 = vld [vmem:[#allocation2 + $0x24] ss:$8 sps:$4 sm:$0xff]  }
  0x15   :  { %313 = vmatpush1.bf16.msra.mxu0 %v797_v1  ;;  %v803_v5 = vld [vmem:[#allocation2 + $0x20] ss:$8 sps:$4 sm:$0xff]   ;;  %v804_v6 = vld [vmem:[#allocation2 + $0x34] ss:$8 sps:$4 sm:$0xff]   ;;  %v806_v7 = vld [vmem:[#allocation2 + $0x30] ss:$8 sps:$4 sm:$0xff]  }
  0x16   :  { %314 = vmatprep.subr.bf16.mxu0 %v798_v2  ;;  %v807_v8 = vld [vmem:[#allocation2 + $0x44] ss:$8 sps:$4 sm:$0xff]   ;;  %v809_v9 = vld [vmem:[#allocation2 + $0x40] ss:$8 sps:$4 sm:$0xff]   ;;  %v810_v10 = vld [vmem:[#allocation2 + $0x54] ss:$8 sps:$4 sm:$0xff]  }
  0x17   :  { %v812_v11 = vld [vmem:[#allocation2 + $0x50] ss:$8 sps:$4 sm:$0xff]   ;;  %v813_v12 = vld [vmem:[#allocation2 + $0x64] ss:$8 sps:$4 sm:$0xff]   ;;  %v815_v14 = vld [vmem:[#allocation2 + $0x60] ss:$8 sps:$4 sm:$0xff]  }
  0x18   :  { %v845_v13 = vld [vmem:[%s1076_s0 + $0x4] ss:$8 sps:$4 sm:$0xff]   ;;  %v816_v15 = vld [vmem:[#allocation2 + $0x74] ss:$8 sps:$4 sm:$0xff]   ;;  %v818_v16 = vld [vmem:[#allocation2 + $0x70] ss:$8 sps:$4 sm:$0xff]  }
  0x19   :  { %315 = vmatpush1.bf16.msra.mxu0 %v800_v3  ;;  %344 = vmatprep.mubr.bf16.mxu0 %v845_v13  ;;  %v819_v17 = vld [vmem:[#allocation2 + $0x84] ss:$8 sps:$4 sm:$0xff]   ;;  %v66_v21 = vld [vmem:[%s1079_s3 + $0x10] sm:$0xff]  ;;  %v67_v22 = vld [vmem:[%s1079_s3 + $0x18] sm:$0xff]  ;;  %vm602_vm0 = vcmask 261120   ;;  %vm620_vm1 = vcmask 253952  }
  0x1a   :  { %316 = vmatprep.subr.bf16.mxu0 %v801_v4  ;;  %v64_v18 = vld [vmem:[%s1079_s3] sm:$0xff]  ;;  %v65_v19 = vld [vmem:[%s1079_s3 + $0x8] sm:$0xff]  ;;  %v763_v24 = vpack.c.bf16 %v67_v22, %v66_v21  ;;  %v822_v27 = vld [vmem:[#allocation2 + $0x94] ss:$8 sps:$4 sm:$0xff]  }
  0x1b   :  { %v759_v20 = vpack.c.bf16 %v65_v19, %v64_v18  ;;  %v821_v23 = vld [vmem:[#allocation2 + $0x80] ss:$8 sps:$4 sm:$0xff]   ;;  %v824_v29 = vld [vmem:[#allocation2 + $0x90] ss:$8 sps:$4 sm:$0xff]   ;;  %v825_v32 = vld [vmem:[#allocation2 + $0xa4] ss:$8 sps:$4 sm:$0xff]  }
  0x1c   :  { %v68_v25 = vld [vmem:[%s1079_s3 + $0x20] sm:$0xff]  ;;  %v69_v26 = vld [vmem:[%s1079_s3 + $0x28] sm:$0xff]  ;;  %v70_v30 = vld [vmem:[%s1079_s3 + $0x30] sm:$0xff] }
  0x1d   :  { %317 = vmatpush1.bf16.msra.mxu0 %v803_v5  ;;  %760 = vmatprep.subr.bf16.mxu1 %v759_v20  ;;  %v767_v28 = vpack.c.bf16 %v69_v26, %v68_v25  ;;  %v71_v31 = vld [vmem:[%s1079_s3 + $0x38] sm:$0xff]  ;;  %v827_v34 = vld [vmem:[#allocation2 + $0xa0] ss:$8 sps:$4 sm:$0xff]   ;;  %v74_v40 = vld [vmem:[%s1079_s3 + $0x50] sm:$0xff] }
  0x1e   :  { %318 = vmatprep.subr.bf16.mxu0 %v804_v6  ;;  %762 = vmatpush3.bf16.msra.mxu1 %v759_v20  ;;  %v771_v33 = vpack.c.bf16 %v71_v31, %v70_v30  ;;  %v72_v35 = vld [vmem:[%s1079_s3 + $0x40] sm:$0xff]  ;;  %v73_v36 = vld [vmem:[%s1079_s3 + $0x48] sm:$0xff]  ;;  %v828_v37 = vld [vmem:[#allocation2 + $0xb4] ss:$8 sps:$4 sm:$0xff]  }
  0x1f   :  { %764 = vmatprep.subr.bf16.mxu1 %v763_v24  ;;  %v775_v38 = vpack.c.bf16 %v73_v36, %v72_v35  ;;  %v830_v39 = vld [vmem:[#allocation2 + $0xb0] ss:$8 sps:$4 sm:$0xff]   ;;  %v831_v42 = vld [vmem:[#allocation2 + $0xc4] ss:$8 sps:$4 sm:$0xff]   ;;  %v833_v44 = vld [vmem:[#allocation2 + $0xc0] ss:$8 sps:$4 sm:$0xff]  }
  0x20   :  { %v75_v41 = vld [vmem:[%s1079_s3 + $0x58] sm:$0xff]  ;;  %v837_v47 = vld [vmem:[#allocation2 + $0xe4] ss:$8 sps:$4 sm:$0xff]   ;;  %v839_v48 = vld [vmem:[#allocation2 + $0xe0] ss:$8 sps:$4 sm:$0xff]  }
  0x21   :  { %319 = vmatpush1.bf16.msra.mxu0 %v806_v7  ;;  %v779_v43 = vpack.c.bf16 %v75_v41, %v74_v40  ;;  %v834_v45 = vld [vmem:[#allocation2 + $0xd4] ss:$8 sps:$4 sm:$0xff]   ;;  %v836_v46 = vld [vmem:[#allocation2 + $0xd0] ss:$8 sps:$4 sm:$0xff]   ;;  %v843_v51 = vld [vmem:[%s1076_s0] ss:$8 sps:$4 sm:$0xff]  }
  0x22   :  { %320 = vmatprep.subr.bf16.mxu0 %v807_v8  ;;  %766 = vmatpush3.bf16.msra.mxu1 %v763_v24  ;;  %v840_v49 = vld [vmem:[#allocation2 + $0xf4] ss:$8 sps:$4 sm:$0xff]   ;;  %v842_v50 = vld [vmem:[#allocation2 + $0xf0] ss:$8 sps:$4 sm:$0xff]   ;;  %v849_v54 = vld [vmem:[%s1076_s0 + $0x24] ss:$8 sps:$4 sm:$0xff]  }
  0x23   :  { %768 = vmatprep.subr.bf16.mxu1 %v767_v28  ;;  %v846_v52 = vld [vmem:[%s1076_s0 + $0x14] ss:$8 sps:$4 sm:$0xff]   ;;  %v848_v53 = vld [vmem:[%s1076_s0 + $0x10] ss:$8 sps:$4 sm:$0xff]   ;;  %v851_v55 = vld [vmem:[%s1076_s0 + $0x20] ss:$8 sps:$4 sm:$0xff]  }
  0x24   :  { %v852_v56 = vld [vmem:[%s1077_s1 + $0x4] ss:$8 sps:$4 sm:$0xff]   ;;  %v854_v57 = vld [vmem:[%s1077_s1] ss:$8 sps:$4 sm:$0xff]   ;;  %v855_v58 = vld [vmem:[%s1077_s1 + $0x14] ss:$8 sps:$4 sm:$0xff]  }
  0x25   :  { %321 = vmatpush1.bf16.msra.mxu0 %v809_v9  ;;  %v857_v59 = vld [vmem:[%s1077_s1 + $0x10] ss:$8 sps:$4 sm:$0xff]   ;;  %v858_v60 = vld [vmem:[%s1077_s1 + $0x24] ss:$8 sps:$4 sm:$0xff]   ;;  %v860_v61 = vld [vmem:[%s1077_s1 + $0x20] ss:$8 sps:$4 sm:$0xff]  }
  0x26   :  { %322 = vmatprep.subr.bf16.mxu0 %v810_v10  ;;  %770 = vmatpush3.bf16.msra.mxu1 %v767_v28  ;;  %v76_v62 = vld [vmem:[%s1079_s3 + $0x60] sm:$0xff]  ;;  %v77_v63 = vld [vmem:[%s1079_s3 + $0x68] sm:$0xff]  ;;  %v78_v1 = vld [vmem:[%s1079_s3 + $0x70] sm:$0xff]  ;;  %s936_s1 = smov [#allocation5]  }
  0x27   :  { %772 = vmatprep.subr.bf16.mxu1 %v771_v33  ;;  %v783_v0 = vpack.c.bf16 %v77_v63, %v76_v62  ;;  %v79_v2 = vld [vmem:[%s1079_s3 + $0x78] sm:$0xff]  ;;  %s628_s3 = sshll.u32 %s936_s1, 4  ;;  %s629_s3 = int_to_ptr.vmem [resolvable:$true] %s628_s3 }
  0x28   :  { %v787_v3 = vpack.c.bf16 %v79_v2, %v78_v1  ;;  %s907_s29 = scalar_lea.vmem %s629_s3, 16  ;;  %s911_s30 = scalar_lea.vmem %s629_s3, 32 }
  0x29   :  { %323 = vmatpush1.bf16.msra.mxu0 %v812_v11  ;;  %p908_p8 = scmp.ne.s32.totalorder %s629_s3, %s907_s29  ;;  %p912_p9 = scmp.lt.s32.totalorder %s629_s3, %s629_s3 }
  0x2a   :  { %324 = vmatprep.subr.bf16.mxu0 %v813_v12  ;;  %774 = vmatpush3.bf16.msra.mxu1 %v771_v33  ;;  %p913_p10 = scmp.lt.s32.totalorder %s911_s30, %s907_s29 }
  0x2b   :  { %776 = vmatprep.subr.bf16.mxu1 %v775_v38 }
  0x2c   :  { %p914_p11 = por %p913_p10, %p912_p9 }
  0x2d   :  { %325 = vmatpush1.bf16.msra.mxu0 %v815_v14 }
  0x2e   :  { %326 = vmatprep.subr.bf16.mxu0 %v816_v15  ;;  %778 = vmatpush3.bf16.msra.mxu1 %v775_v38  ;;  %p915_p12 = pnand %p914_p11, %p908_p8 }
  0x2f   :  { %780 = vmatprep.subr.bf16.mxu1 %v779_v43 }
  0x31   :  { %327 = vmatpush1.bf16.msra.mxu0 %v818_v16 }
  0x32   :  { %328 = vmatprep.subr.bf16.mxu0 %v819_v17  ;;  %782 = vmatpush3.bf16.msra.mxu1 %v779_v43 }
  0x33   :  { %784 = vmatprep.subr.bf16.mxu1 %v783_v0 }
  0x35   :  { %329 = vmatpush1.bf16.msra.mxu0 %v821_v23 }
  0x36   :  { %330 = vmatprep.subr.bf16.mxu0 %v822_v27  ;;  %786 = vmatpush3.bf16.msra.mxu1 %v783_v0 }
  0x37   :  { %788 = vmatprep.subr.bf16.mxu1 %v787_v3 }
  0x39   :  { %331 = vmatpush1.bf16.msra.mxu0 %v824_v29 }
  0x3a   :  { %332 = vmatprep.subr.bf16.mxu0 %v825_v32  ;;  %790 = vmatpush3.bf16.msra.mxu1 %v787_v3 }
  0x3d   :  { %333 = vmatpush1.bf16.msra.mxu0 %v827_v34 }
  0x3e   :  { %334 = vmatprep.subr.bf16.mxu0 %v828_v37 }
  0x41   :  { %335 = vmatpush1.bf16.msra.mxu0 %v830_v39 }
  0x42   :  { %336 = vmatprep.subr.bf16.mxu0 %v831_v42 }
  0x45   :  { %337 = vmatpush1.bf16.msra.mxu0 %v833_v44 }
  0x46   :  { %338 = vmatprep.subr.bf16.mxu0 %v834_v45 }
  0x49   :  { %339 = vmatpush1.bf16.msra.mxu0 %v836_v46 }
  0x4a   :  { %340 = vmatprep.subr.bf16.mxu0 %v837_v47 }
  0x4d   :  { %341 = vmatpush1.bf16.msra.mxu0 %v839_v48 }
  0x4e   :  { %342 = vmatprep.subr.bf16.mxu0 %v840_v49 }
  0x51   :  { %343 = vmatpush1.bf16.msra.mxu0 %v842_v50 }
  0x54   :  { %345 = vmatmul.mubr.bf16.vlgmr.msra.gmra.mrb[0].mxu0 %v843_v51 }
  0x55   :  { %354 = vmatprep.mubr.bf16.mxu0 %v846_v52 }
  0x5c   :  { %355 = vmatmul.mubr.bf16.gmra.mrb[4].mxu0 %v848_v53 }
  0x5d   :  { %364 = vmatprep.mubr.bf16.mxu0 %v849_v54 }
  0x64   :  { %365 = vmatmul.mubr.bf16.gmra.mrb[8].mxu0 %v851_v55 }
  0x65   :  { %374 = vmatprep.mubr.bf16.mxu0 %v852_v56 }
  0x6c   :  { %375 = vmatmul.mubr.bf16.gmra.mrb[12].mxu0 %v854_v57 }
  0x6d   :  { %384 = vmatprep.mubr.bf16.mxu0 %v855_v58 }
  0x74   :  { %385 = vmatmul.mubr.bf16.gmra.mrb[16].mxu0 %v857_v59 }
  0x75   :  { %394 = vmatprep.mubr.bf16.mxu0 %v858_v60 }
  0x7c   :  { %395 = vmatmul.mubr.bf16.gmra.mrb[20].mxu0 %v860_v61 }
 0x127   :  { %v346_v4 = vpop.f32.mrb[0].mxu0 }
 0x128   :  { %v405_v5 = vmul.f32 %v346_v4, %v346_v4  ;;  %v348_v6 = vpop.f32.mrb[1].mxu0 }
 0x129   :  { %v417_v7 = vmul.f32 %v348_v6, %v348_v6  ;;  %v350_v8 = vpop.f32.mrb[2].mxu0 }
 0x12a   :  { %v406_v9 = vmul.f32 %v350_v8, %v350_v8  ;;  %v352_v10 = vpop.f32.mrb[3].mxu0 }
 0x12b   :  { %v418_v11 = vmul.f32 %v352_v10, %v352_v10  ;;  %v429_v12 = vadd.f32 %v417_v7, %v405_v5 }
 0x12d   :  { %v430_v13 = vadd.f32 %v418_v11, %v406_v9  ;;  %741 = vmatprep.mubr.f32.mxu1 %v429_v12 }
 0x12f   :  { %v356_v14 = vpop.f32.mrb[4].mxu0  ;;  %742 = vmatmul.mubr.f32.vlgmr.msra.gmra.mrb[0].mxu1 %v430_v13 }
 0x130   :  { %v407_v15 = vmul.f32 %v356_v14, %v356_v14  ;;  %v358_v16 = vpop.f32.mrb[5].mxu0 }
 0x131   :  { %v419_v17 = vmul.f32 %v358_v16, %v358_v16  ;;  %v360_v18 = vpop.f32.mrb[6].mxu0 }
 0x132   :  { %v408_v19 = vmul.f32 %v360_v18, %v360_v18  ;;  %v362_v20 = vpop.f32.mrb[7].mxu0 }
 0x133   :  { %v431_v21 = vadd.f32 %v419_v17, %v407_v15  ;;  %v420_v22 = vmul.f32 %v362_v20, %v362_v20 }
 0x135   :  { %v432_v23 = vadd.f32 %v420_v22, %v408_v19  ;;  %744 = vmatprep.mubr.f32.mxu1 %v431_v21 }
 0x137   :  { %v366_v24 = vpop.f32.mrb[8].mxu0  ;;  %745 = vmatmul.mubr.f32.gmra.mrb[2].mxu1 %v432_v23 }
 0x138   :  { %v409_v25 = vmul.f32 %v366_v24, %v366_v24  ;;  %v368_v26 = vpop.f32.mrb[9].mxu0 }
 0x139   :  { %v421_v27 = vmul.f32 %v368_v26, %v368_v26  ;;  %v370_v28 = vpop.f32.mrb[10].mxu0 }
 0x13a   :  { %v410_v29 = vmul.f32 %v370_v28, %v370_v28  ;;  %v372_v30 = vpop.f32.mrb[11].mxu0 }
 0x13b   :  { %v433_v31 = vadd.f32 %v421_v27, %v409_v25  ;;  %v422_v32 = vmul.f32 %v372_v30, %v372_v30 }
 0x13d   :  { %v434_v33 = vadd.f32 %v422_v32, %v410_v29  ;;  %747 = vmatprep.mubr.f32.mxu1 %v433_v31 }
 0x13f   :  { %v376_v34 = vpop.f32.mrb[12].mxu0  ;;  %748 = vmatmul.mubr.f32.gmra.mrb[4].mxu1 %v434_v33 }
 0x140   :  { %v411_v35 = vmul.f32 %v376_v34, %v376_v34  ;;  %v378_v36 = vpop.f32.mrb[13].mxu0 }
 0x141   :  { %v423_v37 = vmul.f32 %v378_v36, %v378_v36  ;;  %v380_v38 = vpop.f32.mrb[14].mxu0 }
 0x142   :  { %v412_v39 = vmul.f32 %v380_v38, %v380_v38  ;;  %v382_v40 = vpop.f32.mrb[15].mxu0 }
 0x143   :  { %v435_v41 = vadd.f32 %v423_v37, %v411_v35  ;;  %v424_v42 = vmul.f32 %v382_v40, %v382_v40 }
 0x145   :  { %v436_v43 = vadd.f32 %v424_v42, %v412_v39  ;;  %750 = vmatprep.mubr.f32.mxu1 %v435_v41 }
 0x147   :  { %v386_v44 = vpop.f32.mrb[16].mxu0  ;;  %751 = vmatmul.mubr.f32.gmra.mrb[6].mxu1 %v436_v43 }
 0x148   :  { %v413_v45 = vmul.f32 %v386_v44, %v386_v44  ;;  %v388_v46 = vpop.f32.mrb[17].mxu0 }
 0x149   :  { %v425_v47 = vmul.f32 %v388_v46, %v388_v46  ;;  %v390_v48 = vpop.f32.mrb[18].mxu0 }
 0x14a   :  { %v414_v49 = vmul.f32 %v390_v48, %v390_v48  ;;  %v392_v50 = vpop.f32.mrb[19].mxu0 }
 0x14b   :  { %v437_v51 = vadd.f32 %v425_v47, %v413_v45  ;;  %v426_v52 = vmul.f32 %v392_v50, %v392_v50 }
 0x14d   :  { %v438_v53 = vadd.f32 %v426_v52, %v414_v49  ;;  %753 = vmatprep.mubr.f32.mxu1 %v437_v51 }
 0x14f   :  { %v396_v54 = vpop.f32.mrb[20].mxu0  ;;  %754 = vmatmul.mubr.f32.gmra.mrb[8].mxu1 %v438_v53 }
 0x150   :  { %v415_v55 = vmul.f32 %v396_v54, %v396_v54  ;;  %v398_v56 = vpop.f32.mrb[21].mxu0 }
 0x151   :  { %v427_v57 = vmul.f32 %v398_v56, %v398_v56  ;;  %v400_v58 = vpop.f32.mrb[22].mxu0 }
 0x152   :  { %v416_v59 = vmul.f32 %v400_v58, %v400_v58  ;;  %v402_v60 = vpop.f32.mrb[23].mxu0 }
 0x153   :  { %v439_v61 = vadd.f32 %v427_v57, %v415_v55  ;;  %v428_v62 = vmul.f32 %v402_v60, %v402_v60 }
 0x155   :  { %v440_v63 = vadd.f32 %v428_v62, %v416_v59  ;;  %756 = vmatprep.mubr.f32.mxu1 %v439_v61 }
 0x157   :  { %757 = vmatmul.mubr.f32.gmra.mrb[10].mxu1 %v440_v63 }
 0x202   :  { %v743_v0 = vpop.f32.mrb[0].mxu1 }
 0x203   :  { %v507_v1 = vpop.f32.mrb[1].mxu1  ;;  %v513_v6 = vadd.f32 1e-09, %v743_v0 }
 0x204   :  { %v508_v7 = vadd.f32 1e-09, %v507_v1 }
 0x205   :  { %861 = vlog2.f32 %v513_v6 }
 0x206   :  { %863 = vlog2.f32 %v508_v7 }
 0x20a   :  { %v746_v2 = vpop.f32.mrb[2].mxu1 }
 0x20b   :  { %v517_v3 = vpop.f32.mrb[3].mxu1  ;;  %v523_v12 = vadd.f32 1e-09, %v746_v2 }
 0x20c   :  { %v518_v13 = vadd.f32 1e-09, %v517_v3 }
 0x20f   :  { %v862_v18 = vpop.eup %861 }
 0x210   :  { %v864_v19 = vpop.eup %863  ;;  %v569_v23 = vmul.f32 0.6931472, %v862_v18 }
 0x211   :  { %v567_v26 = vmul.f32 0.6931472, %v864_v19 }
 0x212   :  { %v749_v4 = vpop.f32.mrb[4].mxu1 }
 0x213   :  { %v527_v5 = vpop.f32.mrb[5].mxu1  ;;  %v533_v21 = vadd.f32 1e-09, %v749_v4 }
 0x214   :  { %v528_v24 = vadd.f32 1e-09, %v527_v5 }
 0x21a   :  { %v752_v8 = vpop.f32.mrb[6].mxu1 }
 0x21b   :  { %v543_v9 = vadd.f32 1e-09, %v752_v8  ;;  %v537_v10 = vpop.f32.mrb[7].mxu1 }
 0x21c   :  { %v538_v11 = vadd.f32 1e-09, %v537_v10 }
 0x21d   :  { %865 = vlog2.f32 %v543_v9 }
 0x21e   :  { %867 = vlog2.f32 %v538_v11 }
 0x21f   :  { %869 = vlog2.f32 %v523_v12 }
 0x220   :  { %871 = vlog2.f32 %v518_v13 }
 0x222   :  { %v755_v14 = vpop.f32.mrb[8].mxu1 }
 0x223   :  { %v553_v15 = vadd.f32 1e-09, %v755_v14  ;;  %v547_v16 = vpop.f32.mrb[9].mxu1 }
 0x224   :  { %v548_v17 = vadd.f32 1e-09, %v547_v16 }
 0x225   :  { %873 = vlog2.f32 %v553_v15 }
 0x226   :  { %875 = vlog2.f32 %v548_v17 }
 0x227   :  { %v866_v20 = vpop.eup %865  ;;  %877 = vlog2.f32 %v533_v21 }
 0x228   :  { %v868_v22 = vpop.eup %867  ;;  %v581_v25 = vmul.f32 0.6931472, %v866_v20  ;;  %879 = vlog2.f32 %v528_v24 }
 0x229   :  { %v579_v27 = vmul.f32 0.6931472, %v868_v22  ;;  %v870_v35 = vpop.eup %869 }
 0x22a   :  { %v591_v28 = vsub.f32 %v569_v23, %v581_v25  ;;  %v758_v29 = vpop.f32.mrb[10].mxu1  ;;  %v872_v37 = vpop.eup %871  ;;  %v573_v42 = vmul.f32 0.6931472, %v870_v35 }
 0x22b   :  { %v590_v30 = vsub.f32 %v567_v26, %v579_v27  ;;  %v563_v31 = vadd.f32 1e-09, %v758_v29  ;;  %v557_v32 = vpop.f32.mrb[11].mxu1  ;;  %v571_v45 = vmul.f32 0.6931472, %v872_v37 }
 0x22c   :  { %v597_v33 = vmul.f32 %v591_v28, %v591_v28  ;;  %v558_v34 = vadd.f32 1e-09, %v557_v32 }
 0x22d   :  { %v596_v36 = vmul.f32 %v590_v30, %v590_v30  ;;  %881 = vlog2.f32 %v563_v31 }
 0x22e   :  { %v604_v38 = vsel %vm602_vm0, %v597_v33, 0.0  ;;  %883 = vlog2.f32 %v558_v34 }
 0x22f   :  { %v874_v39 = vpop.eup %873  ;;  %v603_v40 = vsel %vm602_vm0, %v596_v36, 0.0 }
 0x230   :  { %v876_v41 = vpop.eup %875  ;;  %v605_v43 = vadd.f32 %v604_v38, %v603_v40  ;;  %v585_v44 = vmul.f32 0.6931472, %v874_v39 }
 0x231   :  { %v583_v46 = vmul.f32 0.6931472, %v876_v41  ;;  %v878_v49 = vpop.eup %877 }
 0x232   :  { %v593_v47 = vsub.f32 %v573_v42, %v585_v44  ;;  %v880_v52 = vpop.eup %879  ;;  %v577_v56 = vmul.f32 0.6931472, %v878_v49 }
 0x233   :  { %v592_v48 = vsub.f32 %v571_v45, %v583_v46  ;;  %v575_v59 = vmul.f32 0.6931472, %v880_v52 }
 0x234   :  { %v599_v50 = vmul.f32 %v593_v47, %v593_v47 }
 0x235   :  { %v598_v51 = vmul.f32 %v592_v48, %v592_v48 }
 0x236   :  { %v608_v60 = vsel %vm602_vm0, %v599_v50, 0.0 }
 0x237   :  { %v882_v53 = vpop.eup %881  ;;  %v606_v54 = vsel %vm602_vm0, %v598_v51, 0.0 }
 0x238   :  { %v884_v55 = vpop.eup %883  ;;  %v607_v57 = vadd.f32 %v606_v54, %v605_v43  ;;  %v589_v58 = vmul.f32 0.6931472, %v882_v53 }
 0x239   :  { %v587_v61 = vmul.f32 0.6931472, %v884_v55 }
 0x23a   :  { %v595_v62 = vsub.f32 %v577_v56, %v589_v58  ;;  %v609_v63 = vadd.f32 %v608_v60, %v607_v57 }
 0x23b   :  { %v594_v0 = vsub.f32 %v575_v59, %v587_v61 }
 0x23c   :  { %v601_v1 = vmul.f32 %v595_v62, %v595_v62 }
 0x23d   :  { %v600_v2 = vmul.f32 %v594_v0, %v594_v0 }
 0x23e   :  { %v612_v5 = vsel %vm602_vm0, %v601_v1, 0.0 }
 0x23f   :  { %v610_v3 = vsel %vm602_vm0, %v600_v2, 0.0 }
 0x240   :  { %v611_v4 = vadd.f32 %v610_v3, %v609_v63 }
 0x242   :  { %v613_v6 = vadd.f32 %v612_v5, %v611_v4 }
 0x244   :  { %v614_v7 = vrot.slane %v613_v6, 4 }
 0x246   :  { %v615_v8 = vadd.f32 %v614_v7, %v613_v6 }
 0x248   :  { %v616_v9 = vrot.slane %v615_v8, 2 }
 0x24a   :  { %v617_v10 = vadd.f32 %v616_v9, %v615_v8 }
 0x24c   :  { %v618_v11 = vrot.slane %v617_v10, 1 }
 0x24e   :  { %v619_v12 = vadd.f32 %v618_v11, %v617_v10 }
 0x250   :  { %621 = vst.msk [vmem:[#allocation5] sm:$0x1] %vm620_vm1, %v619_v12 }
 0x251   :  { %918 = shalt.err (!%p915_p12)
}
 0x252   :  { %s919_s7 = scalar_lea.hbm %s1080_s4, 16 }
 0x253   :  { %p920_p13 = scmp.ne.s32.totalorder %s1080_s4, %s919_s7  ;;  %p923_p0 = scmp.lt.u32.totalorder %s919_s7, %s1080_s4 }
 0x255   :  { %p925_p1 = pnand %p923_p0, %p920_p13 }
 0x257   :  { %928 = shalt.err (!%p925_p1)
}
 0x258   :  { %631 = dma.vmem_to_hbm [thread:$0]  %s629_s3, 16, %s1080_s4, [#allocation4]  }
 0x259   :  { %931 = dma.done.wait [#allocation4], 16  }
 0x25a   :  { %932 = vsyncadd [#allocation4], 4294967280 }
 0x25b   :  { %635 = vsyncpa [#allocation3], 1 }
 0x25c   :  { %636 = vsyncpa [#allocation4], 1 }

</bundles_post_ra>
